<compile_context>
chip_gen: v5e
topology: v5e:2x2
jax: 0.10.0
libtpu: 0.0.40
codegen_flags: <defaults>
</compile_context>

<pallas_src>
import functools

import jax
import jax.numpy as jnp
from jax.experimental import pallas as pl
from jax.experimental.pallas import tpu as pltpu

LEAKY_SLOPE = 0.01  # nn.LeakyReLU default negative_slope
_LANE = 128
_SUBLANE = 8


def _round_up(x, m):
    return ((x + m - 1) // m) * m


def _fused_mlp_kernel(x_ref, w_ref, b_ref, o_ref, *, n_layers, compute_dtype):
    # x_ref: (TB, P) f32        w_ref: (L+1, P, P) compute_dtype
    # b_ref: (L+1, 1, P) f32    o_ref: (TB, P) f32
    # All intermediate activations stay on-chip (VMEM/vregs) for the whole MLP.
    h = x_ref[...]
    for layer in range(n_layers + 1):
        y = jnp.dot(h.astype(compute_dtype), w_ref[layer],
                    preferred_element_type=jnp.float32)
        y = y + b_ref[layer]                      # (1, P) broadcasts over batch tile
        if layer < n_layers:
            h = jnp.where(y >= 0, y, LEAKY_SLOPE * y)   # LeakyReLU
        else:
            h = y                                  # head: Linear only
    o_ref[...] = h.astype(o_ref.dtype)             # single lane-dense (128-wide) store


def mlp_forward(x, params, *, compute_dtype=jnp.bfloat16, batch_tile=128):
    """Whole MLP forward in one fused Pallas TPU kernel.

    params: list of (w, b) with w: (din, dout) f32, b: (dout,) f32,
            layout y = x @ w + b (== PyTorch x @ W.T + b).
    """
    B, input_dim = x.shape
    n_layers = len(params) - 1
    output_dim = params[-1][0].shape[1]

    # Uniform lane-dense padded feature width for every layer.
    dims = [input_dim] + [w.shape[1] for (w, _) in params]
    P = max(_round_up(d, _LANE) for d in dims)

    # Batch tiling: sublane-aligned tile, pad batch up to a tile multiple.
    TB = batch_tile if B >= batch_tile else _round_up(B, _SUBLANE)
    B_p = _round_up(B, TB)

    # Stack + zero-pad weights/biases -> (L+1, P, P) and (L+1, 1, P).
    # Zero padding keeps the math exact (padded K rows/cols contribute nothing).
    w_stack = jnp.zeros((n_layers + 1, P, P), jnp.float32)
    b_stack = jnp.zeros((n_layers + 1, 1, P), jnp.float32)
    for l, (w, b) in enumerate(params):
        din, dout = w.shape
        w_stack = w_stack.at[l, :din, :dout].set(w.astype(jnp.float32))
        b_stack = b_stack.at[l, 0, :dout].set(b.reshape(-1).astype(jnp.float32))
    w_stack = w_stack.astype(compute_dtype)   # bf16 weights: half the VMEM/HBM traffic

    x_p = jnp.zeros((B_p, P), jnp.float32).at[:B, :input_dim].set(x.astype(jnp.float32))

    flops = 2 * B * sum(w.shape[0] * w.shape[1] for (w, _) in params)
    bytes_accessed = (x_p.size * 4 + B_p * P * 4
                      + w_stack.size * w_stack.dtype.itemsize + b_stack.size * 4)

    kernel = functools.partial(_fused_mlp_kernel, n_layers=n_layers,
                               compute_dtype=compute_dtype)

    out_p = pl.pallas_call(
        kernel,
        out_shape=jax.ShapeDtypeStruct((B_p, P), jnp.float32),
        grid=(B_p // TB,),
        in_specs=[
            pl.BlockSpec((TB, P), lambda i: (i, 0)),                  # batch tile of x
            pl.BlockSpec((n_layers + 1, P, P), lambda i: (0, 0, 0)),  # all weights resident
            pl.BlockSpec((n_layers + 1, 1, P), lambda i: (0, 0, 0)),  # all biases resident
        ],
        out_specs=pl.BlockSpec((TB, P), lambda i: (i, 0)),
        compiler_params=pltpu.CompilerParams(
            dimension_semantics=("parallel",),    # batch axis shards across TCs
        ),
        cost_estimate=pl.CostEstimate(flops=flops, transcendentals=0,
                                      bytes_accessed=bytes_accessed),
    )(x_p, w_stack, b_stack)

    return out_p[:B, :output_dim]


def init_mlp_params(key, input_dim, output_dim, n_layers, hidden_dim):
    """nn.Linear-style init: U(-1/sqrt(fan_in), 1/sqrt(fan_in)) for W and b."""
    dims = []
    d = input_dim
    for _ in range(n_layers):
        dims.append((d, hidden_dim))
        d = hidden_dim
    dims.append((d, output_dim))

    params = []
    for (din, dout) in dims:
        key, kw, kb = jax.random.split(key, 3)
        bound = 1.0 / float(din) ** 0.5
        w = jax.random.uniform(kw, (din, dout), jnp.float32, -bound, bound)
        b = jax.random.uniform(kb, (dout,), jnp.float32, -bound, bound)
        params.append((w, b))
    return params


def mlp_reference(x, params, *, compute_dtype=jnp.float32):
    """Pure-JAX reference with the same per-layer math (optionally bf16 operands)."""
    h = x.astype(jnp.float32)
    n = len(params)
    for l, (w, b) in enumerate(params):
        y = jnp.dot(h.astype(compute_dtype), w.astype(compute_dtype),
                    preferred_element_type=jnp.float32,
                    precision=jax.lax.Precision.HIGHEST)
        y = y + b.reshape(1, -1).astype(jnp.float32)
        h = jnp.where(y >= 0, y, LEAKY_SLOPE * y) if l < n - 1 else y
    return h


if __name__ == "__main__":
    input_dim, output_dim, n_layers, hidden_dim = 16, 4, 3, 32
    batch = 8

    key = jax.random.PRNGKey(0)
    key, kx = jax.random.split(key)
    x = jax.random.normal(kx, (batch, input_dim), jnp.float32)
    params = init_mlp_params(key, input_dim, output_dim, n_layers, hidden_dim)

    # Fused kernel, bf16 MXU operands with f32 accumulation (v6e/v7x-preferred path).
    y = jax.block_until_ready(mlp_forward(x, params, compute_dtype=jnp.bfloat16))
    assert y.shape == (batch, output_dim)

    ref_bf16 = mlp_reference(x, params, compute_dtype=jnp.bfloat16)
    ref_f32 = mlp_reference(x, params, compute_dtype=jnp.float32)
    assert jnp.allclose(y, ref_bf16, atol=1e-2, rtol=1e-2), "mismatch vs bf16 reference"
    assert jnp.allclose(y, ref_f32, atol=5e-2, rtol=5e-2), "mismatch vs f32 reference"

    # f32-operand path also supported (loose tolerance: MXU f32 pass count may differ).
    y32 = jax.block_until_ready(mlp_forward(x, params, compute_dtype=jnp.float32))
    assert y32.shape == (batch, output_dim)
    assert jnp.allclose(y32, ref_f32, atol=5e-2, rtol=5e-2), "mismatch (f32) vs reference"

    print("KERNEL_OK")
</pallas_src>

<mosaic_0001>
module attributes {stable_mosaic.version = 11 : i64} {
  func.func @_fused_mlp_kernel(%arg0: i32, %arg1: memref<8x128xf32, #tpu.memory_space<vmem>>, %arg2: memref<4x128x128xbf16, #tpu.memory_space<vmem>>, %arg3: memref<4x1x128xf32, #tpu.memory_space<vmem>>, %arg4: memref<8x128xf32, #tpu.memory_space<vmem>>) attributes {dimension_semantics = [#tpu.dimension_semantics<parallel>], iteration_bounds = array<i64: 1>, scalar_prefetch = 0 : i64, scratch_operands = 0 : i64, tpu.core_type = #tpu.core_type<tc>, window_params = [{transform_indices = @transform_0, window_bounds = array<i64: 8, 128>}, {pipeline_mode = #tpu.pipeline_mode<synchronous>, transform_indices = @transform_1, window_bounds = array<i64: 4, 128, 128>}, {pipeline_mode = #tpu.pipeline_mode<synchronous>, transform_indices = @transform_2, window_bounds = array<i64: 4, 1, 128>}, {transform_indices = @transform_3, window_bounds = array<i64: 8, 128>}]} {
    %c0 = arith.constant 0 : index
    %c0_0 = arith.constant 0 : index
    %0 = vector.load %arg1[%c0, %c0_0] : memref<8x128xf32, #tpu.memory_space<vmem>>, vector<8x128xf32>
    %1 = arith.truncf %0 : vector<8x128xf32> to vector<8x128xbf16>
    %c0_1 = arith.constant 0 : index
    %c0_2 = arith.constant 0 : index
    %c0_3 = arith.constant 0 : index
    %2 = vector.load %arg2[%c0_1, %c0_2, %c0_3] : memref<4x128x128xbf16, #tpu.memory_space<vmem>>, vector<1x128x128xbf16>
    %3 = vector.shape_cast %2 : vector<1x128x128xbf16> to vector<128x128xbf16>
    %cst = arith.constant dense<0.000000e+00> : vector<8x128xf32>
    %4 = tpu.matmul %1, %3, %cst {dimension_numbers = #tpu.dot_dimension_numbers<[1], [0], [0], [1], [0, 0, 1, 1], [], []>} : vector<8x128xbf16>, vector<128x128xbf16>, vector<8x128xf32> -> vector<8x128xf32>
    %c0_4 = arith.constant 0 : index
    %c0_5 = arith.constant 0 : index
    %c0_6 = arith.constant 0 : index
    %5 = vector.load %arg3[%c0_4, %c0_5, %c0_6] : memref<4x1x128xf32, #tpu.memory_space<vmem>>, vector<1x1x128xf32>
    %6 = vector.shape_cast %5 : vector<1x1x128xf32> to vector<1x128xf32>
    %7 = vector.broadcast %6 : vector<1x128xf32> to vector<8x128xf32>
    %8 = arith.addf %4, %7 : vector<8x128xf32>
    %cst_7 = arith.constant 0.000000e+00 : f32
    %9 = vector.broadcast %cst_7 : f32 to vector<8x128xf32>
    %10 = arith.cmpf oge, %8, %9 : vector<8x128xf32>
    %cst_8 = arith.constant 0.00999999977 : f32
    %11 = vector.broadcast %cst_8 : f32 to vector<8x128xf32>
    %12 = arith.mulf %11, %8 : vector<8x128xf32>
    %13 = arith.select %10, %8, %12 : vector<8x128xi1>, vector<8x128xf32>
    %14 = arith.truncf %13 : vector<8x128xf32> to vector<8x128xbf16>
    %c1 = arith.constant 1 : index
    %c0_9 = arith.constant 0 : index
    %c0_10 = arith.constant 0 : index
    %15 = vector.load %arg2[%c1, %c0_9, %c0_10] : memref<4x128x128xbf16, #tpu.memory_space<vmem>>, vector<1x128x128xbf16>
    %16 = vector.shape_cast %15 : vector<1x128x128xbf16> to vector<128x128xbf16>
    %cst_11 = arith.constant dense<0.000000e+00> : vector<8x128xf32>
    %17 = tpu.matmul %14, %16, %cst_11 {dimension_numbers = #tpu.dot_dimension_numbers<[1], [0], [0], [1], [0, 0, 1, 1], [], []>} : vector<8x128xbf16>, vector<128x128xbf16>, vector<8x128xf32> -> vector<8x128xf32>
    %c1_12 = arith.constant 1 : index
    %c0_13 = arith.constant 0 : index
    %c0_14 = arith.constant 0 : index
    %18 = vector.load %arg3[%c1_12, %c0_13, %c0_14] : memref<4x1x128xf32, #tpu.memory_space<vmem>>, vector<1x1x128xf32>
    %19 = vector.shape_cast %18 : vector<1x1x128xf32> to vector<1x128xf32>
    %20 = vector.broadcast %19 : vector<1x128xf32> to vector<8x128xf32>
    %21 = arith.addf %17, %20 : vector<8x128xf32>
    %cst_15 = arith.constant 0.000000e+00 : f32
    %22 = vector.broadcast %cst_15 : f32 to vector<8x128xf32>
    %23 = arith.cmpf oge, %21, %22 : vector<8x128xf32>
    %cst_16 = arith.constant 0.00999999977 : f32
    %24 = vector.broadcast %cst_16 : f32 to vector<8x128xf32>
    %25 = arith.mulf %24, %21 : vector<8x128xf32>
    %26 = arith.select %23, %21, %25 : vector<8x128xi1>, vector<8x128xf32>
    %27 = arith.truncf %26 : vector<8x128xf32> to vector<8x128xbf16>
    %c2 = arith.constant 2 : index
    %c0_17 = arith.constant 0 : index
    %c0_18 = arith.constant 0 : index
    %28 = vector.load %arg2[%c2, %c0_17, %c0_18] : memref<4x128x128xbf16, #tpu.memory_space<vmem>>, vector<1x128x128xbf16>
    %29 = vector.shape_cast %28 : vector<1x128x128xbf16> to vector<128x128xbf16>
    %cst_19 = arith.constant dense<0.000000e+00> : vector<8x128xf32>
    %30 = tpu.matmul %27, %29, %cst_19 {dimension_numbers = #tpu.dot_dimension_numbers<[1], [0], [0], [1], [0, 0, 1, 1], [], []>} : vector<8x128xbf16>, vector<128x128xbf16>, vector<8x128xf32> -> vector<8x128xf32>
    %c2_20 = arith.constant 2 : index
    %c0_21 = arith.constant 0 : index
    %c0_22 = arith.constant 0 : index
    %31 = vector.load %arg3[%c2_20, %c0_21, %c0_22] : memref<4x1x128xf32, #tpu.memory_space<vmem>>, vector<1x1x128xf32>
    %32 = vector.shape_cast %31 : vector<1x1x128xf32> to vector<1x128xf32>
    %33 = vector.broadcast %32 : vector<1x128xf32> to vector<8x128xf32>
    %34 = arith.addf %30, %33 : vector<8x128xf32>
    %cst_23 = arith.constant 0.000000e+00 : f32
    %35 = vector.broadcast %cst_23 : f32 to vector<8x128xf32>
    %36 = arith.cmpf oge, %34, %35 : vector<8x128xf32>
    %cst_24 = arith.constant 0.00999999977 : f32
    %37 = vector.broadcast %cst_24 : f32 to vector<8x128xf32>
    %38 = arith.mulf %37, %34 : vector<8x128xf32>
    %39 = arith.select %36, %34, %38 : vector<8x128xi1>, vector<8x128xf32>
    %40 = arith.truncf %39 : vector<8x128xf32> to vector<8x128xbf16>
    %c3 = arith.constant 3 : index
    %c0_25 = arith.constant 0 : index
    %c0_26 = arith.constant 0 : index
    %41 = vector.load %arg2[%c3, %c0_25, %c0_26] : memref<4x128x128xbf16, #tpu.memory_space<vmem>>, vector<1x128x128xbf16>
    %42 = vector.shape_cast %41 : vector<1x128x128xbf16> to vector<128x128xbf16>
    %cst_27 = arith.constant dense<0.000000e+00> : vector<8x128xf32>
    %43 = tpu.matmul %40, %42, %cst_27 {dimension_numbers = #tpu.dot_dimension_numbers<[1], [0], [0], [1], [0, 0, 1, 1], [], []>} : vector<8x128xbf16>, vector<128x128xbf16>, vector<8x128xf32> -> vector<8x128xf32>
    %c3_28 = arith.constant 3 : index
    %c0_29 = arith.constant 0 : index
    %c0_30 = arith.constant 0 : index
    %44 = vector.load %arg3[%c3_28, %c0_29, %c0_30] : memref<4x1x128xf32, #tpu.memory_space<vmem>>, vector<1x1x128xf32>
    %45 = vector.shape_cast %44 : vector<1x1x128xf32> to vector<1x128xf32>
    %46 = vector.broadcast %45 : vector<1x128xf32> to vector<8x128xf32>
    %47 = arith.addf %43, %46 : vector<8x128xf32>
    %c0_31 = arith.constant 0 : index
    %c0_32 = arith.constant 0 : index
    %48 = vector.load %arg4[%c0_31, %c0_32] : memref<8x128xf32, #tpu.memory_space<vmem>>, vector<8x128xf32>
    tpu.vector_store %arg4[%c0_31, %c0_32], %47 {strides = array<i32>} : memref<8x128xf32, #tpu.memory_space<vmem>>, vector<8x128xf32>,
    return
  }
  func.func @transform_0(%arg0: i32) -> (i32, i32) {
    %c0_i32 = arith.constant 0 : i32
    %c0_i32_0 = arith.constant 0 : i32
    return %arg0, %c0_i32 : i32, i32
  }
  func.func @transform_1(%arg0: i32) -> (i32, i32, i32) {
    %c0_i32 = arith.constant 0 : i32
    %c0_i32_0 = arith.constant 0 : i32
    %c0_i32_1 = arith.constant 0 : i32
    %c0_i32_2 = arith.constant 0 : i32
    return %c0_i32, %c0_i32_0, %c0_i32_1 : i32, i32, i32
  }
  func.func @transform_2(%arg0: i32) -> (i32, i32, i32) {
    %c0_i32 = arith.constant 0 : i32
    %c0_i32_0 = arith.constant 0 : i32
    %c0_i32_1 = arith.constant 0 : i32
    %c0_i32_2 = arith.constant 0 : i32
    return %c0_i32, %c0_i32_0, %c0_i32_1 : i32, i32, i32
  }
  func.func @transform_3(%arg0: i32) -> (i32, i32) {
    %c0_i32 = arith.constant 0 : i32
    %c0_i32_0 = arith.constant 0 : i32
    return %arg0, %c0_i32 : i32, i32
  }
}

</mosaic_0001>

<bundles_post_ra>
// kernel: tpu_custom_call.1
= control target key start
LH: loop header
LB: loop body
LE: loop exit
PB: predicated region body
PF: predicated region fallthrough
CT: control target
= control target key end

     0   :  { %8 = vsyncpa [#allocation3], 0  ;;  %s737_s0 = inlined_call_operand.hbm [shape: f32[8,128], index: 0, kind: input, shape index: {}]   ;;  %s738_s1 = inlined_call_operand.hbm [shape: bf16[4,128,128], index: 1, kind: input, shape index: {}]   ;;  %s739_s2 = inlined_call_operand.hbm [shape: f32[4,1,128], index: 2, kind: input, shape index: {}]   ;;  %s740_s3 = inlined_call_operand.hbm [shape: f32[8,128], index: 3, kind: output, shape index: {}]  }
   0x1   :  { %9 = vsyncpa [#allocation6], 0  ;;  %s26_s14 = sshll.u32 %s738_s1, 4  ;;  %s27_s14 = int_to_ptr.hbm [resolvable:$true] %s26_s14 }
   0x2   :  { %10 = vsyncpa [#allocation4], 0  ;;  %s697_s15 = smov [#allocation5]   ;;  %s16_s19 = sshll.u32 %s737_s0, 4  ;;  %s17_s19 = int_to_ptr.hbm [resolvable:$true] %s16_s19 }
   0x3   :  { %s28_s16 = sshll.u32 %s697_s15, 4  ;;  %s698_s20 = smov 64   ;;  %s29_s16 = int_to_ptr.vmem [resolvable:$true] %s28_s16 }
   0x4   :  { %s699_s21 = smov 4   ;;  %s700_s22 = smov [#allocation2]  }
   0x5   :  { %34 = dma.hbm_to_vmem [thread:$0]  %s27_s14, 4096, %s29_s16, [#allocation6], %s698_s20, %s698_s20, %s699_s21  }
   0x6   :  { %s18_s23 = sshll.u32 %s700_s22, 4  ;;  %s39_s26 = sshll.u32 %s739_s2, 4  ;;  %s19_s23 = int_to_ptr.vmem [resolvable:$true] %s18_s23  ;;  %s40_s26 = int_to_ptr.hbm [resolvable:$true] %s39_s26 }
   0x7   :  { %21 = dma.hbm_to_vmem [thread:$0]  %s17_s19, 128, %s19_s23, [#allocation3]  }
   0x8   :  { %s701_s1 = smov [#allocation7]   ;;  %s702_s28 = smov 16  }
   0x9   :  { %s41_s27 = sshll.u32 %s701_s1, 4  ;;  %s703_s29 = smov 1   ;;  %s42_s27 = int_to_ptr.vmem [resolvable:$true] %s41_s27 }
   0xa   :  { %47 = dma.hbm_to_vmem [thread:$0]  %s40_s26, 64, %s42_s27, [#allocation6], %s702_s28, %s702_s28, %s703_s29  }
   0xb   :  { %691 = dma.done.wait [#allocation3], 128  }
   0xc   :  { %692 = vsyncadd [#allocation3], 4294967168 }
   0xd   :  { %693 = dma.done.wait [#allocation6], 4160  }
   0xe   :  { %694 = vsyncadd [#allocation6], 4294963136  ;;  %v558_v0 = vld [vmem:[#allocation5 + $0x38] sm:$0xff]  ;;  %v557_v1 = vld [vmem:[#allocation5 + $0x30] sm:$0xff]  ;;  %s704_s0 = smov [#allocation8]   ;;  %s412_s5 = sshll.u32 %s740_s3, 4  ;;  %s413_s5 = int_to_ptr.hbm [resolvable:$true] %s412_s5 }
   0xf   :  { %130 = vmatpush.bf16.msra.mxu0 %v558_v0  ;;  %v566_v2 = vld [vmem:[#allocation5 + $0x78] sm:$0xff]  ;;  %v565_v3 = vld [vmem:[#allocation5 + $0x70] sm:$0xff]  ;;  %v556_v4 = vld [vmem:[#allocation5 + $0x28] sm:$0xff]  ;;  %s410_s2 = sshll.u32 %s704_s0, 4  ;;  %s411_s2 = int_to_ptr.vmem [resolvable:$true] %s410_s2 }
  0x10   :  { %217 = vmatpush.bf16.msra.mxu1 %v566_v2  ;;  %v564_v5 = vld [vmem:[#allocation5 + $0x68] sm:$0xff]  ;;  %v555_v6 = vld [vmem:[#allocation5 + $0x20] sm:$0xff]  ;;  %v554_v8 = vld [vmem:[#allocation5 + $0x18] sm:$0xff] }
  0x11   :  { %v563_v7 = vld [vmem:[#allocation5 + $0x60] sm:$0xff]  ;;  %v562_v9 = vld [vmem:[#allocation5 + $0x58] sm:$0xff]  ;;  %v553_v10 = vld [vmem:[#allocation5 + $0x10] sm:$0xff] }
  0x12   :  { %v561_v11 = vld [vmem:[#allocation5 + $0x50] sm:$0xff]  ;;  %v552_v12 = vld [vmem:[#allocation5 + $0x8] sm:$0xff]  ;;  %v551_v13 = vld [vmem:[#allocation5] sm:$0xff] }
  0x13   :  { %131 = vmatpush.bf16.msra.mxu0 %v557_v1  ;;  %v60_v14 = vld [vmem:[#allocation2] sm:$0xff]  ;;  %v560_v16 = vld [vmem:[#allocation5 + $0x48] sm:$0xff]  ;;  %v559_v17 = vld [vmem:[#allocation5 + $0x40] sm:$0xff] }
  0x14   :  { %218 = vmatpush.bf16.msra.mxu1 %v565_v3  ;;  %v61_v15 = vpack.c.bf16 %v60_v14, %v60_v14  ;;  %v574_v18 = vld [vmem:[#allocation5 + $0xb8] sm:$0xff]  ;;  %v573_v19 = vld [vmem:[#allocation5 + $0xb0] sm:$0xff]  ;;  %v572_v20 = vld [vmem:[#allocation5 + $0xa8] sm:$0xff] }
  0x15   :  { %304 = vmatpush.bf16.msra.mxu2 %v574_v18  ;;  %v571_v21 = vld [vmem:[#allocation5 + $0xa0] sm:$0xff]  ;;  %v570_v22 = vld [vmem:[#allocation5 + $0x98] sm:$0xff]  ;;  %v569_v23 = vld [vmem:[#allocation5 + $0x90] sm:$0xff] }
  0x16   :  { %v591_v24 = vld [vmem:[#allocation7] ss:$0 sm:$0xff]  ;;  %v568_v31 = vld [vmem:[#allocation5 + $0x88] sm:$0xff]  ;;  %v582_v33 = vld [vmem:[#allocation5 + $0xf8] sm:$0xff] }
  0x17   :  { %132 = vmatpush.bf16.msra.mxu0 %v556_v4  ;;  %v567_v32 = vld [vmem:[#allocation5 + $0x80] sm:$0xff]  ;;  %391 = vmatpush.bf16.msra.mxu3 %v582_v33  ;;  %v581_v34 = vld [vmem:[#allocation5 + $0xf0] sm:$0xff]  ;;  %v580_v35 = vld [vmem:[#allocation5 + $0xe8] sm:$0xff] }
  0x18   :  { %219 = vmatpush.bf16.msra.mxu1 %v564_v5  ;;  %v579_v36 = vld [vmem:[#allocation5 + $0xe0] sm:$0xff]  ;;  %v578_v37 = vld [vmem:[#allocation5 + $0xd8] sm:$0xff]  ;;  %v577_v38 = vld [vmem:[#allocation5 + $0xd0] sm:$0xff] }
  0x19   :  { %305 = vmatpush.bf16.msra.mxu2 %v573_v19  ;;  %v592_v39 = vld [vmem:[#allocation7 + $0x1] ss:$0 sm:$0xff]  ;;  %v576_v46 = vld [vmem:[#allocation5 + $0xc8] sm:$0xff]  ;;  %v593_v48 = vld [vmem:[#allocation7 + $0x2] ss:$0 sm:$0xff] }
  0x1a   :  { %v575_v47 = vld [vmem:[#allocation5 + $0xc0] sm:$0xff] }
  0x1b   :  { %133 = vmatpush.bf16.msra.mxu0 %v555_v6  ;;  %392 = vmatpush.bf16.msra.mxu3 %v581_v34  ;;  %v594_v55 = vld [vmem:[#allocation7 + $0x3] ss:$0 sm:$0xff] }
  0x1c   :  { %220 = vmatpush.bf16.msra.mxu1 %v563_v7 }
  0x1d   :  { %306 = vmatpush.bf16.msra.mxu2 %v572_v20 }
  0x1f   :  { %134 = vmatpush.bf16.msra.mxu0 %v554_v8  ;;  %393 = vmatpush.bf16.msra.mxu3 %v580_v35 }
  0x20   :  { %221 = vmatpush.bf16.msra.mxu1 %v562_v9 }
  0x21   :  { %307 = vmatpush.bf16.msra.mxu2 %v571_v21 }
  0x23   :  { %135 = vmatpush.bf16.msra.mxu0 %v553_v10  ;;  %394 = vmatpush.bf16.msra.mxu3 %v579_v36 }
  0x24   :  { %222 = vmatpush.bf16.msra.mxu1 %v561_v11 }
  0x25   :  { %308 = vmatpush.bf16.msra.mxu2 %v570_v22 }
  0x27   :  { %136 = vmatpush.bf16.msra.mxu0 %v552_v12  ;;  %395 = vmatpush.bf16.msra.mxu3 %v578_v37 }
  0x28   :  { %223 = vmatpush.bf16.msra.mxu1 %v560_v16 }
  0x29   :  { %309 = vmatpush.bf16.msra.mxu2 %v569_v23 }
  0x2b   :  { %137 = vmatpush.bf16.msra.mxu0 %v551_v13  ;;  %396 = vmatpush.bf16.msra.mxu3 %v577_v38 }
  0x2c   :  { %224 = vmatpush.bf16.msra.mxu1 %v559_v17 }
  0x2d   :  { %310 = vmatpush.bf16.msra.mxu2 %v568_v31 }
  0x2e   :  { %138 = vmatmul.bf16.vlgmr.msra.gmra.mxu0 %v61_v15 }
  0x2f   :  { %397 = vmatpush.bf16.msra.mxu3 %v576_v46 }
  0x31   :  { %311 = vmatpush.bf16.msra.mxu2 %v567_v32 }
  0x33   :  { %398 = vmatpush.bf16.msra.mxu3 %v575_v47 }
  0xab   :  { %v139_v25 = vpop.f32.mrf.mxu0 }
  0xac   :  { %v140_v26 = vadd.f32 %v591_v24, %v139_v25 }
  0xae   :  { %v144_v27 = vmul.f32 0.01, %v140_v26  ;;  %vm143_vm0 = vcmp.ge.f32.partialorder %v140_v26, 0.0 }
  0xb0   :  { %v145_v28 = vsel %vm143_vm0, %v140_v26, %v144_v27 }
  0xb1   :  { %v146_v29 = vpack.c.bf16 %v145_v28, %v145_v28 }
  0xb3   :  { %v141_v30 = vpop.f32.mrf.mxu0  ;;  %225 = vmatmul.bf16.vlgmr.msra.gmra.mxu1 %v146_v29 }
 0x130   :  { %v226_v40 = vpop.f32.mrf.mxu1 }
 0x131   :  { %v227_v41 = vadd.f32 %v592_v39, %v226_v40 }
 0x133   :  { %v231_v42 = vmul.f32 0.01, %v227_v41  ;;  %vm230_vm1 = vcmp.ge.f32.partialorder %v227_v41, 0.0 }
 0x135   :  { %v232_v43 = vsel %vm230_vm1, %v227_v41, %v231_v42 }
 0x136   :  { %v233_v44 = vpack.c.bf16 %v232_v43, %v232_v43 }
 0x138   :  { %v228_v45 = vpop.f32.mrf.mxu1  ;;  %312 = vmatmul.bf16.vlgmr.msra.gmra.mxu2 %v233_v44 }
 0x1bb   :  { %v313_v49 = vpop.f32.mrf.mxu2 }
 0x1bc   :  { %v314_v50 = vadd.f32 %v593_v48, %v313_v49 }
 0x1be   :  { %v318_v51 = vmul.f32 0.01, %v314_v50  ;;  %vm317_vm2 = vcmp.ge.f32.partialorder %v314_v50, 0.0 }
 0x1c0   :  { %v319_v52 = vsel %vm317_vm2, %v314_v50, %v318_v51 }
 0x1c1   :  { %v320_v53 = vpack.c.bf16 %v319_v52, %v319_v52 }
 0x1c3   :  { %v315_v54 = vpop.f32.mrf.mxu2  ;;  %399 = vmatmul.bf16.vlgmr.msra.gmra.mxu3 %v320_v53 }
 0x246   :  { %v400_v56 = vpop.f32.mrf.mxu3 }
 0x247   :  { %v401_v57 = vadd.f32 %v594_v55, %v400_v56 }
 0x249   :  { %404 = vst [vmem:[#allocation8] sm:$0xff] %v401_v57 }
 0x24a   :  { %415 = dma.vmem_to_hbm [thread:$0]  %s411_s2, 128, %s413_s5, [#allocation4]  }
 0x24e   :  { %v402_v58 = vpop.f32.mrf.mxu3 }
 0x24f   :  { %695 = dma.done.wait [#allocation4], 128  }
 0x250   :  { %696 = vsyncadd [#allocation4], 4294967168 }
 0x251   :  { %420 = vsyncpa [#allocation3], 1 }
 0x252   :  { %421 = vsyncpa [#allocation6], 1 }
 0x253   :  { %422 = vsyncpa [#allocation4], 1 }

</bundles_post_ra>
